<compile_context>
chip_gen: v7x
topology: tpu7x:2x2x1
jax: 0.10.0
libtpu: 0.0.40
codegen_flags: <defaults>
</compile_context>

<pallas_src>
import jax
import jax.numpy as jnp
from jax.experimental import pallas as pl
from jax.experimental.pallas import tpu as pltpu
import numpy as np

LANE = 128  # TPU vreg lane width


def lstm_fc_kernel(x_ref, w_ih_ref, w_hh_ref, b_ref, w_fc_ref, b_fc_ref, out_ref):
    """Full LSTM recurrence + final Linear on one TensorCore (compact gate layout).

    x_ref    : (B, T)      f32  inputs, I == 1 squeezed; one (8,128) VMEM tile
    w_ih_ref : (1, 4*H)    f32  input weight row (I == 1)
    w_hh_ref : (H, 4*H)    f32  recurrent weights (w_hh.T), gate order [i,f,g,o]
    b_ref    : (1, 4*H)    f32  combined b_ih + b_hh
    w_fc_ref : (H, OUTP)   f32  fc weights (w_fc.T), zero-padded cols to OUTP
    b_fc_ref : (1, OUTP)   f32
    out_ref  : (B, OUTP)   f32  lane-dense padded output
    """
    B, T = x_ref.shape
    H = w_hh_ref.shape[0]

    # Loop-invariant loads hoisted once (w_hh = 64 KiB = 16 vregs; cheap to hold).
    w_hh = w_hh_ref[...]        # (H, 4H)
    w_ih = w_ih_ref[...]        # (1, 4H)
    b = b_ref[...]              # (1, 4H)

    h = jnp.zeros((B, H), jnp.float32)
    c = jnp.zeros((B, H), jnp.float32)

    # T is static & small -> fully unrolled recurrence (scheduler hides EUP
    # sigmoid/tanh and MXU result pops under the previous step's tail).
    for t in range(T):
        # Per-step input projection (rank-1, I == 1): recomputed each step so it
        # never holds T*B*4H values live; independent of h -> off critical path.
        xw_t = x_ref[:, t:t + 1] * w_ih + b                       # (B, 4H)
        # Serial critical path: h @ w_hh on the MXU.
        gates = jnp.dot(h, w_hh, preferred_element_type=jnp.float32) + xw_t
        # Static lane slices at H-boundaries (XLU selects; XLU slot is idle here).
        i_g = jax.nn.sigmoid(gates[:, 0 * H:1 * H])
        f_g = jax.nn.sigmoid(gates[:, 1 * H:2 * H])
        g_g = jnp.tanh(gates[:, 2 * H:3 * H])
        o_g = jax.nn.sigmoid(gates[:, 3 * H:4 * H])
        c = f_g * c + i_g * g_g
        h = o_g * jnp.tanh(c)

    # Final Linear on h_T; output block is lane-dense (OUTP = multiple of 128).
    out_ref[...] = (
        jnp.dot(h, w_fc_ref[...], preferred_element_type=jnp.float32)
        + b_fc_ref[...]
    )


def lstm_model_forward(x, params):
    """x: (B, T, 1) float32 (batch_first, like the PyTorch module). Returns (B, OUT)."""
    w_ih, w_hh, b_ih, b_hh, w_fc, b_fc = params
    B, T, I = x.shape
    assert I == 1, "LSTMModel spec has input_size == 1"
    H = w_hh.shape[1]
    OUT = w_fc.shape[0]
    OUTP = ((OUT + LANE - 1) // LANE) * LANE

    # ---- plain-JAX glue: layout / zero-padding only ----
    x_bt = x[:, :, 0]                                              # (B, T)
    w_ih_row = w_ih.reshape(1, 4 * H)                              # (1, 4H)
    b_row = (b_ih + b_hh).reshape(1, 4 * H)                        # (1, 4H)
    w_hh_k = jnp.transpose(w_hh, (1, 0))                           # (H, 4H)
    w_fc_pad = jnp.pad(jnp.transpose(w_fc, (1, 0)),
                       ((0, 0), (0, OUTP - OUT)))                  # (H, OUTP)
    b_fc_pad = jnp.pad(b_fc, (0, OUTP - OUT)).reshape(1, OUTP)     # (1, OUTP)

    vmem = pl.BlockSpec(memory_space=pltpu.MemorySpace.VMEM)
    out_pad = pl.pallas_call(
        lstm_fc_kernel,
        out_shape=jax.ShapeDtypeStruct((B, OUTP), jnp.float32),
        in_specs=[vmem] * 6,
        out_specs=vmem,
    )(x_bt, w_ih_row, w_hh_k, b_row, w_fc_pad, b_fc_pad)
    return out_pad[:, :OUT]


def _reference_forward(x, params):
    """Pure-JAX reference matching PyTorch nn.LSTM + Linear semantics."""
    w_ih, w_hh, b_ih, b_hh, w_fc, b_fc = params
    B, T, _I = x.shape
    H = w_hh.shape[1]
    h = jnp.zeros((B, H), jnp.float32)
    c = jnp.zeros((B, H), jnp.float32)
    for t in range(T):
        gates = x[:, t, :] @ w_ih.T + b_ih + h @ w_hh.T + b_hh
        i_g = jax.nn.sigmoid(gates[:, 0 * H:1 * H])
        f_g = jax.nn.sigmoid(gates[:, 1 * H:2 * H])
        g_g = jnp.tanh(gates[:, 2 * H:3 * H])
        o_g = jax.nn.sigmoid(gates[:, 3 * H:4 * H])
        c = f_g * c + i_g * g_g
        h = o_g * jnp.tanh(c)
    return h @ w_fc.T + b_fc


def init_params(key, input_size=1, hidden=64, output_size=5):
    # PyTorch-style uniform(-1/sqrt(H), 1/sqrt(H)) init, deterministic from the key.
    k = 1.0 / np.sqrt(hidden)
    keys = jax.random.split(key, 6)
    w_ih = jax.random.uniform(keys[0], (4 * hidden, input_size), jnp.float32, -k, k)
    w_hh = jax.random.uniform(keys[1], (4 * hidden, hidden), jnp.float32, -k, k)
    b_ih = jax.random.uniform(keys[2], (4 * hidden,), jnp.float32, -k, k)
    b_hh = jax.random.uniform(keys[3], (4 * hidden,), jnp.float32, -k, k)
    w_fc = jax.random.uniform(keys[4], (output_size, hidden), jnp.float32, -k, k)
    b_fc = jax.random.uniform(keys[5], (output_size,), jnp.float32, -k, k)
    return (w_ih, w_hh, b_ih, b_hh, w_fc, b_fc)


if __name__ == "__main__":
    B, T, I, H, OUT = 2, 8, 1, 64, 5
    key = jax.random.PRNGKey(0)
    k_x, k_p = jax.random.split(key)
    x = jax.random.normal(k_x, (B, T, I), jnp.float32)
    params = init_params(k_p, input_size=I, hidden=H, output_size=OUT)

    out = lstm_model_forward(x, params)
    out = jax.block_until_ready(out)

    ref = jax.block_until_ready(_reference_forward(x, params))
    assert out.shape == (B, OUT)
    np.testing.assert_allclose(np.asarray(out), np.asarray(ref), rtol=1e-5, atol=1e-5)

    print("KERNEL_OK")
</pallas_src>

<mosaic_0001>
module attributes {stable_mosaic.version = 11 : i64} {
  func.func @lstm_fc_kernel(%arg0: memref<2x8xf32, #tpu.memory_space<vmem>>, %arg1: memref<1x256xf32, #tpu.memory_space<vmem>>, %arg2: memref<64x256xf32, #tpu.memory_space<vmem>>, %arg3: memref<1x256xf32, #tpu.memory_space<vmem>>, %arg4: memref<64x128xf32, #tpu.memory_space<vmem>>, %arg5: memref<1x128xf32, #tpu.memory_space<vmem>>, %arg6: memref<2x128xf32, #tpu.memory_space<vmem>>) attributes {dimension_semantics = [], scalar_prefetch = 0 : i64, scratch_operands = 0 : i64, tpu.core_type = #tpu.core_type<tc>} {
    %c0 = arith.constant 0 : index
    %c0_0 = arith.constant 0 : index
    %0 = vector.load %arg2[%c0, %c0_0] : memref<64x256xf32, #tpu.memory_space<vmem>>, vector<64x256xf32>
    %c0_1 = arith.constant 0 : index
    %c0_2 = arith.constant 0 : index
    %1 = vector.load %arg1[%c0_1, %c0_2] : memref<1x256xf32, #tpu.memory_space<vmem>>, vector<1x256xf32>
    %c0_3 = arith.constant 0 : index
    %c0_4 = arith.constant 0 : index
    %2 = vector.load %arg3[%c0_3, %c0_4] : memref<1x256xf32, #tpu.memory_space<vmem>>, vector<1x256xf32>
    %cst = arith.constant 0.000000e+00 : f32
    %3 = vector.broadcast %cst : f32 to vector<2x64xf32>
    %cst_5 = arith.constant 0.000000e+00 : f32
    %4 = vector.broadcast %cst_5 : f32 to vector<2x64xf32>
    %c0_6 = arith.constant 0 : index
    %c0_7 = arith.constant 0 : index
    %5 = vector.load %arg0[%c0_6, %c0_7] : memref<2x8xf32, #tpu.memory_space<vmem>>, vector<2x1xf32>
    %6 = vector.broadcast %5 : vector<2x1xf32> to vector<2x256xf32>
    %7 = vector.broadcast %1 : vector<1x256xf32> to vector<2x256xf32>
    %8 = arith.mulf %6, %7 : vector<2x256xf32>
    %9 = vector.broadcast %2 : vector<1x256xf32> to vector<2x256xf32>
    %10 = arith.addf %8, %9 : vector<2x256xf32>
    %cst_8 = arith.constant dense<0.000000e+00> : vector<2x256xf32>
    %11 = tpu.matmul %3, %0, %cst_8 {dimension_numbers = #tpu.dot_dimension_numbers<[1], [0], [0], [1], [0, 0, 1, 1], [], []>} : vector<2x64xf32>, vector<64x256xf32>, vector<2x256xf32> -> vector<2x256xf32>
    %12 = arith.addf %11, %10 : vector<2x256xf32>
    %13 = vector.extract_strided_slice %12 {offsets = [0, 0], sizes = [2, 64], strides = [1, 1]} : vector<2x256xf32> to vector<2x64xf32>
    %14 = arith.negf %13 : vector<2x64xf32>
    %15 = math.exp %14 : vector<2x64xf32>
    %cst_9 = arith.constant 1.000000e+00 : f32
    %16 = vector.broadcast %cst_9 : f32 to vector<2x64xf32>
    %17 = arith.addf %16, %15 : vector<2x64xf32>
    %18 = arith.divf %16, %17 : vector<2x64xf32>
    %19 = vector.extract_strided_slice %12 {offsets = [0, 64], sizes = [2, 64], strides = [1, 1]} : vector<2x256xf32> to vector<2x64xf32>
    %20 = arith.negf %19 : vector<2x64xf32>
    %21 = math.exp %20 : vector<2x64xf32>
    %cst_10 = arith.constant 1.000000e+00 : f32
    %22 = vector.broadcast %cst_10 : f32 to vector<2x64xf32>
    %23 = arith.addf %22, %21 : vector<2x64xf32>
    %24 = arith.divf %22, %23 : vector<2x64xf32>
    %25 = vector.extract_strided_slice %12 {offsets = [0, 128], sizes = [2, 64], strides = [1, 1]} : vector<2x256xf32> to vector<2x64xf32>
    %26 = math.tanh %25 : vector<2x64xf32>
    %27 = vector.extract_strided_slice %12 {offsets = [0, 192], sizes = [2, 64], strides = [1, 1]} : vector<2x256xf32> to vector<2x64xf32>
    %28 = arith.negf %27 : vector<2x64xf32>
    %29 = math.exp %28 : vector<2x64xf32>
    %cst_11 = arith.constant 1.000000e+00 : f32
    %30 = vector.broadcast %cst_11 : f32 to vector<2x64xf32>
    %31 = arith.addf %30, %29 : vector<2x64xf32>
    %32 = arith.divf %30, %31 : vector<2x64xf32>
    %33 = arith.mulf %24, %4 : vector<2x64xf32>
    %34 = arith.mulf %18, %26 : vector<2x64xf32>
    %35 = arith.addf %33, %34 : vector<2x64xf32>
    %36 = math.tanh %35 : vector<2x64xf32>
    %37 = arith.mulf %32, %36 : vector<2x64xf32>
    %c0_12 = arith.constant 0 : index
    %c1 = arith.constant 1 : index
    %38 = vector.load %arg0[%c0_12, %c1] : memref<2x8xf32, #tpu.memory_space<vmem>>, vector<2x1xf32>
    %39 = vector.broadcast %38 : vector<2x1xf32> to vector<2x256xf32>
    %40 = vector.broadcast %1 : vector<1x256xf32> to vector<2x256xf32>
    %41 = arith.mulf %39, %40 : vector<2x256xf32>
    %42 = vector.broadcast %2 : vector<1x256xf32> to vector<2x256xf32>
    %43 = arith.addf %41, %42 : vector<2x256xf32>
    %cst_13 = arith.constant dense<0.000000e+00> : vector<2x256xf32>
    %44 = tpu.matmul %37, %0, %cst_13 {dimension_numbers = #tpu.dot_dimension_numbers<[1], [0], [0], [1], [0, 0, 1, 1], [], []>} : vector<2x64xf32>, vector<64x256xf32>, vector<2x256xf32> -> vector<2x256xf32>
    %45 = arith.addf %44, %43 : vector<2x256xf32>
    %46 = vector.extract_strided_slice %45 {offsets = [0, 0], sizes = [2, 64], strides = [1, 1]} : vector<2x256xf32> to vector<2x64xf32>
    %47 = arith.negf %46 : vector<2x64xf32>
    %48 = math.exp %47 : vector<2x64xf32>
    %cst_14 = arith.constant 1.000000e+00 : f32
    %49 = vector.broadcast %cst_14 : f32 to vector<2x64xf32>
    %50 = arith.addf %49, %48 : vector<2x64xf32>
    %51 = arith.divf %49, %50 : vector<2x64xf32>
    %52 = vector.extract_strided_slice %45 {offsets = [0, 64], sizes = [2, 64], strides = [1, 1]} : vector<2x256xf32> to vector<2x64xf32>
    %53 = arith.negf %52 : vector<2x64xf32>
    %54 = math.exp %53 : vector<2x64xf32>
    %cst_15 = arith.constant 1.000000e+00 : f32
    %55 = vector.broadcast %cst_15 : f32 to vector<2x64xf32>
    %56 = arith.addf %55, %54 : vector<2x64xf32>
    %57 = arith.divf %55, %56 : vector<2x64xf32>
    %58 = vector.extract_strided_slice %45 {offsets = [0, 128], sizes = [2, 64], strides = [1, 1]} : vector<2x256xf32> to vector<2x64xf32>
    %59 = math.tanh %58 : vector<2x64xf32>
    %60 = vector.extract_strided_slice %45 {offsets = [0, 192], sizes = [2, 64], strides = [1, 1]} : vector<2x256xf32> to vector<2x64xf32>
    %61 = arith.negf %60 : vector<2x64xf32>
    %62 = math.exp %61 : vector<2x64xf32>
    %cst_16 = arith.constant 1.000000e+00 : f32
    %63 = vector.broadcast %cst_16 : f32 to vector<2x64xf32>
    %64 = arith.addf %63, %62 : vector<2x64xf32>
    %65 = arith.divf %63, %64 : vector<2x64xf32>
    %66 = arith.mulf %57, %35 : vector<2x64xf32>
    %67 = arith.mulf %51, %59 : vector<2x64xf32>
    %68 = arith.addf %66, %67 : vector<2x64xf32>
    %69 = math.tanh %68 : vector<2x64xf32>
    %70 = arith.mulf %65, %69 : vector<2x64xf32>
    %c0_17 = arith.constant 0 : index
    %c2 = arith.constant 2 : index
    %71 = vector.load %arg0[%c0_17, %c2] : memref<2x8xf32, #tpu.memory_space<vmem>>, vector<2x1xf32>
    %72 = vector.broadcast %71 : vector<2x1xf32> to vector<2x256xf32>
    %73 = vector.broadcast %1 : vector<1x256xf32> to vector<2x256xf32>
    %74 = arith.mulf %72, %73 : vector<2x256xf32>
    %75 = vector.broadcast %2 : vector<1x256xf32> to vector<2x256xf32>
    %76 = arith.addf %74, %75 : vector<2x256xf32>
    %cst_18 = arith.constant dense<0.000000e+00> : vector<2x256xf32>
    %77 = tpu.matmul %70, %0, %cst_18 {dimension_numbers = #tpu.dot_dimension_numbers<[1], [0], [0], [1], [0, 0, 1, 1], [], []>} : vector<2x64xf32>, vector<64x256xf32>, vector<2x256xf32> -> vector<2x256xf32>
    %78 = arith.addf %77, %76 : vector<2x256xf32>
    %79 = vector.extract_strided_slice %78 {offsets = [0, 0], sizes = [2, 64], strides = [1, 1]} : vector<2x256xf32> to vector<2x64xf32>
    %80 = arith.negf %79 : vector<2x64xf32>
    %81 = math.exp %80 : vector<2x64xf32>
    %cst_19 = arith.constant 1.000000e+00 : f32
    %82 = vector.broadcast %cst_19 : f32 to vector<2x64xf32>
    %83 = arith.addf %82, %81 : vector<2x64xf32>
    %84 = arith.divf %82, %83 : vector<2x64xf32>
    %85 = vector.extract_strided_slice %78 {offsets = [0, 64], sizes = [2, 64], strides = [1, 1]} : vector<2x256xf32> to vector<2x64xf32>
    %86 = arith.negf %85 : vector<2x64xf32>
    %87 = math.exp %86 : vector<2x64xf32>
    %cst_20 = arith.constant 1.000000e+00 : f32
    %88 = vector.broadcast %cst_20 : f32 to vector<2x64xf32>
    %89 = arith.addf %88, %87 : vector<2x64xf32>
    %90 = arith.divf %88, %89 : vector<2x64xf32>
    %91 = vector.extract_strided_slice %78 {offsets = [0, 128], sizes = [2, 64], strides = [1, 1]} : vector<2x256xf32> to vector<2x64xf32>
    %92 = math.tanh %91 : vector<2x64xf32>
    %93 = vector.extract_strided_slice %78 {offsets = [0, 192], sizes = [2, 64], strides = [1, 1]} : vector<2x256xf32> to vector<2x64xf32>
    %94 = arith.negf %93 : vector<2x64xf32>
    %95 = math.exp %94 : vector<2x64xf32>
    %cst_21 = arith.constant 1.000000e+00 : f32
    %96 = vector.broadcast %cst_21 : f32 to vector<2x64xf32>
    %97 = arith.addf %96, %95 : vector<2x64xf32>
    %98 = arith.divf %96, %97 : vector<2x64xf32>
    %99 = arith.mulf %90, %68 : vector<2x64xf32>
    %100 = arith.mulf %84, %92 : vector<2x64xf32>
    %101 = arith.addf %99, %100 : vector<2x64xf32>
    %102 = math.tanh %101 : vector<2x64xf32>
    %103 = arith.mulf %98, %102 : vector<2x64xf32>
    %c0_22 = arith.constant 0 : index
    %c3 = arith.constant 3 : index
    %104 = vector.load %arg0[%c0_22, %c3] : memref<2x8xf32, #tpu.memory_space<vmem>>, vector<2x1xf32>
    %105 = vector.broadcast %104 : vector<2x1xf32> to vector<2x256xf32>
    %106 = vector.broadcast %1 : vector<1x256xf32> to vector<2x256xf32>
    %107 = arith.mulf %105, %106 : vector<2x256xf32>
    %108 = vector.broadcast %2 : vector<1x256xf32> to vector<2x256xf32>
    %109 = arith.addf %107, %108 : vector<2x256xf32>
    %cst_23 = arith.constant dense<0.000000e+00> : vector<2x256xf32>
    %110 = tpu.matmul %103, %0, %cst_23 {dimension_numbers = #tpu.dot_dimension_numbers<[1], [0], [0], [1], [0, 0, 1, 1], [], []>} : vector<2x64xf32>, vector<64x256xf32>, vector<2x256xf32> -> vector<2x256xf32>
    %111 = arith.addf %110, %109 : vector<2x256xf32>
    %112 = vector.extract_strided_slice %111 {offsets = [0, 0], sizes = [2, 64], strides = [1, 1]} : vector<2x256xf32> to vector<2x64xf32>
    %113 = arith.negf %112 : vector<2x64xf32>
    %114 = math.exp %113 : vector<2x64xf32>
    %cst_24 = arith.constant 1.000000e+00 : f32
    %115 = vector.broadcast %cst_24 : f32 to vector<2x64xf32>
    %116 = arith.addf %115, %114 : vector<2x64xf32>
    %117 = arith.divf %115, %116 : vector<2x64xf32>
    %118 = vector.extract_strided_slice %111 {offsets = [0, 64], sizes = [2, 64], strides = [1, 1]} : vector<2x256xf32> to vector<2x64xf32>
    %119 = arith.negf %118 : vector<2x64xf32>
    %120 = math.exp %119 : vector<2x64xf32>
    %cst_25 = arith.constant 1.000000e+00 : f32
    %121 = vector.broadcast %cst_25 : f32 to vector<2x64xf32>
    %122 = arith.addf %121, %120 : vector<2x64xf32>
    %123 = arith.divf %121, %122 : vector<2x64xf32>
    %124 = vector.extract_strided_slice %111 {offsets = [0, 128], sizes = [2, 64], strides = [1, 1]} : vector<2x256xf32> to vector<2x64xf32>
    %125 = math.tanh %124 : vector<2x64xf32>
    %126 = vector.extract_strided_slice %111 {offsets = [0, 192], sizes = [2, 64], strides = [1, 1]} : vector<2x256xf32> to vector<2x64xf32>
    %127 = arith.negf %126 : vector<2x64xf32>
    %128 = math.exp %127 : vector<2x64xf32>
    %cst_26 = arith.constant 1.000000e+00 : f32
    %129 = vector.broadcast %cst_26 : f32 to vector<2x64xf32>
    %130 = arith.addf %129, %128 : vector<2x64xf32>
    %131 = arith.divf %129, %130 : vector<2x64xf32>
    %132 = arith.mulf %123, %101 : vector<2x64xf32>
    %133 = arith.mulf %117, %125 : vector<2x64xf32>
    %134 = arith.addf %132, %133 : vector<2x64xf32>
    %135 = math.tanh %134 : vector<2x64xf32>
    %136 = arith.mulf %131, %135 : vector<2x64xf32>
    %c0_27 = arith.constant 0 : index
    %c4 = arith.constant 4 : index
    %137 = vector.load %arg0[%c0_27, %c4] : memref<2x8xf32, #tpu.memory_space<vmem>>, vector<2x1xf32>
    %138 = vector.broadcast %137 : vector<2x1xf32> to vector<2x256xf32>
    %139 = vector.broadcast %1 : vector<1x256xf32> to vector<2x256xf32>
    %140 = arith.mulf %138, %139 : vector<2x256xf32>
    %141 = vector.broadcast %2 : vector<1x256xf32> to vector<2x256xf32>
    %142 = arith.addf %140, %141 : vector<2x256xf32>
    %cst_28 = arith.constant dense<0.000000e+00> : vector<2x256xf32>
    %143 = tpu.matmul %136, %0, %cst_28 {dimension_numbers = #tpu.dot_dimension_numbers<[1], [0], [0], [1], [0, 0, 1, 1], [], []>} : vector<2x64xf32>, vector<64x256xf32>, vector<2x256xf32> -> vector<2x256xf32>
    %144 = arith.addf %143, %142 : vector<2x256xf32>
    %145 = vector.extract_strided_slice %144 {offsets = [0, 0], sizes = [2, 64], strides = [1, 1]} : vector<2x256xf32> to vector<2x64xf32>
    %146 = arith.negf %145 : vector<2x64xf32>
    %147 = math.exp %146 : vector<2x64xf32>
    %cst_29 = arith.constant 1.000000e+00 : f32
    %148 = vector.broadcast %cst_29 : f32 to vector<2x64xf32>
    %149 = arith.addf %148, %147 : vector<2x64xf32>
    %150 = arith.divf %148, %149 : vector<2x64xf32>
    %151 = vector.extract_strided_slice %144 {offsets = [0, 64], sizes = [2, 64], strides = [1, 1]} : vector<2x256xf32> to vector<2x64xf32>
    %152 = arith.negf %151 : vector<2x64xf32>
    %153 = math.exp %152 : vector<2x64xf32>
    %cst_30 = arith.constant 1.000000e+00 : f32
    %154 = vector.broadcast %cst_30 : f32 to vector<2x64xf32>
    %155 = arith.addf %154, %153 : vector<2x64xf32>
    %156 = arith.divf %154, %155 : vector<2x64xf32>
    %157 = vector.extract_strided_slice %144 {offsets = [0, 128], sizes = [2, 64], strides = [1, 1]} : vector<2x256xf32> to vector<2x64xf32>
    %158 = math.tanh %157 : vector<2x64xf32>
    %159 = vector.extract_strided_slice %144 {offsets = [0, 192], sizes = [2, 64], strides = [1, 1]} : vector<2x256xf32> to vector<2x64xf32>
    %160 = arith.negf %159 : vector<2x64xf32>
    %161 = math.exp %160 : vector<2x64xf32>
    %cst_31 = arith.constant 1.000000e+00 : f32
    %162 = vector.broadcast %cst_31 : f32 to vector<2x64xf32>
    %163 = arith.addf %162, %161 : vector<2x64xf32>
    %164 = arith.divf %162, %163 : vector<2x64xf32>
    %165 = arith.mulf %156, %134 : vector<2x64xf32>
    %166 = arith.mulf %150, %158 : vector<2x64xf32>
    %167 = arith.addf %165, %166 : vector<2x64xf32>
    %168 = math.tanh %167 : vector<2x64xf32>
    %169 = arith.mulf %164, %168 : vector<2x64xf32>
    %c0_32 = arith.constant 0 : index
    %c5 = arith.constant 5 : index
    %170 = vector.load %arg0[%c0_32, %c5] : memref<2x8xf32, #tpu.memory_space<vmem>>, vector<2x1xf32>
    %171 = vector.broadcast %170 : vector<2x1xf32> to vector<2x256xf32>
    %172 = vector.broadcast %1 : vector<1x256xf32> to vector<2x256xf32>
    %173 = arith.mulf %171, %172 : vector<2x256xf32>
    %174 = vector.broadcast %2 : vector<1x256xf32> to vector<2x256xf32>
    %175 = arith.addf %173, %174 : vector<2x256xf32>
    %cst_33 = arith.constant dense<0.000000e+00> : vector<2x256xf32>
    %176 = tpu.matmul %169, %0, %cst_33 {dimension_numbers = #tpu.dot_dimension_numbers<[1], [0], [0], [1], [0, 0, 1, 1], [], []>} : vector<2x64xf32>, vector<64x256xf32>, vector<2x256xf32> -> vector<2x256xf32>
    %177 = arith.addf %176, %175 : vector<2x256xf32>
    %178 = vector.extract_strided_slice %177 {offsets = [0, 0], sizes = [2, 64], strides = [1, 1]} : vector<2x256xf32> to vector<2x64xf32>
    %179 = arith.negf %178 : vector<2x64xf32>
    %180 = math.exp %179 : vector<2x64xf32>
    %cst_34 = arith.constant 1.000000e+00 : f32
    %181 = vector.broadcast %cst_34 : f32 to vector<2x64xf32>
    %182 = arith.addf %181, %180 : vector<2x64xf32>
    %183 = arith.divf %181, %182 : vector<2x64xf32>
    %184 = vector.extract_strided_slice %177 {offsets = [0, 64], sizes = [2, 64], strides = [1, 1]} : vector<2x256xf32> to vector<2x64xf32>
    %185 = arith.negf %184 : vector<2x64xf32>
    %186 = math.exp %185 : vector<2x64xf32>
    %cst_35 = arith.constant 1.000000e+00 : f32
    %187 = vector.broadcast %cst_35 : f32 to vector<2x64xf32>
    %188 = arith.addf %187, %186 : vector<2x64xf32>
    %189 = arith.divf %187, %188 : vector<2x64xf32>
    %190 = vector.extract_strided_slice %177 {offsets = [0, 128], sizes = [2, 64], strides = [1, 1]} : vector<2x256xf32> to vector<2x64xf32>
    %191 = math.tanh %190 : vector<2x64xf32>
    %192 = vector.extract_strided_slice %177 {offsets = [0, 192], sizes = [2, 64], strides = [1, 1]} : vector<2x256xf32> to vector<2x64xf32>
    %193 = arith.negf %192 : vector<2x64xf32>
    %194 = math.exp %193 : vector<2x64xf32>
    %cst_36 = arith.constant 1.000000e+00 : f32
    %195 = vector.broadcast %cst_36 : f32 to vector<2x64xf32>
    %196 = arith.addf %195, %194 : vector<2x64xf32>
    %197 = arith.divf %195, %196 : vector<2x64xf32>
    %198 = arith.mulf %189, %167 : vector<2x64xf32>
    %199 = arith.mulf %183, %191 : vector<2x64xf32>
    %200 = arith.addf %198, %199 : vector<2x64xf32>
    %201 = math.tanh %200 : vector<2x64xf32>
    %202 = arith.mulf %197, %201 : vector<2x64xf32>
    %c0_37 = arith.constant 0 : index
    %c6 = arith.constant 6 : index
    %203 = vector.load %arg0[%c0_37, %c6] : memref<2x8xf32, #tpu.memory_space<vmem>>, vector<2x1xf32>
    %204 = vector.broadcast %203 : vector<2x1xf32> to vector<2x256xf32>
    %205 = vector.broadcast %1 : vector<1x256xf32> to vector<2x256xf32>
    %206 = arith.mulf %204, %205 : vector<2x256xf32>
    %207 = vector.broadcast %2 : vector<1x256xf32> to vector<2x256xf32>
    %208 = arith.addf %206, %207 : vector<2x256xf32>
    %cst_38 = arith.constant dense<0.000000e+00> : vector<2x256xf32>
    %209 = tpu.matmul %202, %0, %cst_38 {dimension_numbers = #tpu.dot_dimension_numbers<[1], [0], [0], [1], [0, 0, 1, 1], [], []>} : vector<2x64xf32>, vector<64x256xf32>, vector<2x256xf32> -> vector<2x256xf32>
    %210 = arith.addf %209, %208 : vector<2x256xf32>
    %211 = vector.extract_strided_slice %210 {offsets = [0, 0], sizes = [2, 64], strides = [1, 1]} : vector<2x256xf32> to vector<2x64xf32>
    %212 = arith.negf %211 : vector<2x64xf32>
    %213 = math.exp %212 : vector<2x64xf32>
    %cst_39 = arith.constant 1.000000e+00 : f32
    %214 = vector.broadcast %cst_39 : f32 to vector<2x64xf32>
    %215 = arith.addf %214, %213 : vector<2x64xf32>
    %216 = arith.divf %214, %215 : vector<2x64xf32>
    %217 = vector.extract_strided_slice %210 {offsets = [0, 64], sizes = [2, 64], strides = [1, 1]} : vector<2x256xf32> to vector<2x64xf32>
    %218 = arith.negf %217 : vector<2x64xf32>
    %219 = math.exp %218 : vector<2x64xf32>
    %cst_40 = arith.constant 1.000000e+00 : f32
    %220 = vector.broadcast %cst_40 : f32 to vector<2x64xf32>
    %221 = arith.addf %220, %219 : vector<2x64xf32>
    %222 = arith.divf %220, %221 : vector<2x64xf32>
    %223 = vector.extract_strided_slice %210 {offsets = [0, 128], sizes = [2, 64], strides = [1, 1]} : vector<2x256xf32> to vector<2x64xf32>
    %224 = math.tanh %223 : vector<2x64xf32>
    %225 = vector.extract_strided_slice %210 {offsets = [0, 192], sizes = [2, 64], strides = [1, 1]} : vector<2x256xf32> to vector<2x64xf32>
    %226 = arith.negf %225 : vector<2x64xf32>
    %227 = math.exp %226 : vector<2x64xf32>
    %cst_41 = arith.constant 1.000000e+00 : f32
    %228 = vector.broadcast %cst_41 : f32 to vector<2x64xf32>
    %229 = arith.addf %228, %227 : vector<2x64xf32>
    %230 = arith.divf %228, %229 : vector<2x64xf32>
    %231 = arith.mulf %222, %200 : vector<2x64xf32>
    %232 = arith.mulf %216, %224 : vector<2x64xf32>
    %233 = arith.addf %231, %232 : vector<2x64xf32>
    %234 = math.tanh %233 : vector<2x64xf32>
    %235 = arith.mulf %230, %234 : vector<2x64xf32>
    %c0_42 = arith.constant 0 : index
    %c7 = arith.constant 7 : index
    %236 = vector.load %arg0[%c0_42, %c7] : memref<2x8xf32, #tpu.memory_space<vmem>>, vector<2x1xf32>
    %237 = vector.broadcast %236 : vector<2x1xf32> to vector<2x256xf32>
    %238 = vector.broadcast %1 : vector<1x256xf32> to vector<2x256xf32>
    %239 = arith.mulf %237, %238 : vector<2x256xf32>
    %240 = vector.broadcast %2 : vector<1x256xf32> to vector<2x256xf32>
    %241 = arith.addf %239, %240 : vector<2x256xf32>
    %cst_43 = arith.constant dense<0.000000e+00> : vector<2x256xf32>
    %242 = tpu.matmul %235, %0, %cst_43 {dimension_numbers = #tpu.dot_dimension_numbers<[1], [0], [0], [1], [0, 0, 1, 1], [], []>} : vector<2x64xf32>, vector<64x256xf32>, vector<2x256xf32> -> vector<2x256xf32>
    %243 = arith.addf %242, %241 : vector<2x256xf32>
    %244 = vector.extract_strided_slice %243 {offsets = [0, 0], sizes = [2, 64], strides = [1, 1]} : vector<2x256xf32> to vector<2x64xf32>
    %245 = arith.negf %244 : vector<2x64xf32>
    %246 = math.exp %245 : vector<2x64xf32>
    %cst_44 = arith.constant 1.000000e+00 : f32
    %247 = vector.broadcast %cst_44 : f32 to vector<2x64xf32>
    %248 = arith.addf %247, %246 : vector<2x64xf32>
    %249 = arith.divf %247, %248 : vector<2x64xf32>
    %250 = vector.extract_strided_slice %243 {offsets = [0, 64], sizes = [2, 64], strides = [1, 1]} : vector<2x256xf32> to vector<2x64xf32>
    %251 = arith.negf %250 : vector<2x64xf32>
    %252 = math.exp %251 : vector<2x64xf32>
    %cst_45 = arith.constant 1.000000e+00 : f32
    %253 = vector.broadcast %cst_45 : f32 to vector<2x64xf32>
    %254 = arith.addf %253, %252 : vector<2x64xf32>
    %255 = arith.divf %253, %254 : vector<2x64xf32>
    %256 = vector.extract_strided_slice %243 {offsets = [0, 128], sizes = [2, 64], strides = [1, 1]} : vector<2x256xf32> to vector<2x64xf32>
    %257 = math.tanh %256 : vector<2x64xf32>
    %258 = vector.extract_strided_slice %243 {offsets = [0, 192], sizes = [2, 64], strides = [1, 1]} : vector<2x256xf32> to vector<2x64xf32>
    %259 = arith.negf %258 : vector<2x64xf32>
    %260 = math.exp %259 : vector<2x64xf32>
    %cst_46 = arith.constant 1.000000e+00 : f32
    %261 = vector.broadcast %cst_46 : f32 to vector<2x64xf32>
    %262 = arith.addf %261, %260 : vector<2x64xf32>
    %263 = arith.divf %261, %262 : vector<2x64xf32>
    %264 = arith.mulf %255, %233 : vector<2x64xf32>
    %265 = arith.mulf %249, %257 : vector<2x64xf32>
    %266 = arith.addf %264, %265 : vector<2x64xf32>
    %267 = math.tanh %266 : vector<2x64xf32>
    %268 = arith.mulf %263, %267 : vector<2x64xf32>
    %c0_47 = arith.constant 0 : index
    %c0_48 = arith.constant 0 : index
    %269 = vector.load %arg4[%c0_47, %c0_48] : memref<64x128xf32, #tpu.memory_space<vmem>>, vector<64x128xf32>
    %cst_49 = arith.constant dense<0.000000e+00> : vector<2x128xf32>
    %270 = tpu.matmul %268, %269, %cst_49 {dimension_numbers = #tpu.dot_dimension_numbers<[1], [0], [0], [1], [0, 0, 1, 1], [], []>} : vector<2x64xf32>, vector<64x128xf32>, vector<2x128xf32> -> vector<2x128xf32>
    %c0_50 = arith.constant 0 : index
    %c0_51 = arith.constant 0 : index
    %271 = vector.load %arg5[%c0_50, %c0_51] : memref<1x128xf32, #tpu.memory_space<vmem>>, vector<1x128xf32>
    %272 = vector.broadcast %271 : vector<1x128xf32> to vector<2x128xf32>
    %273 = arith.addf %270, %272 : vector<2x128xf32>
    %c0_52 = arith.constant 0 : index
    %c0_53 = arith.constant 0 : index
    %274 = vector.load %arg6[%c0_52, %c0_53] : memref<2x128xf32, #tpu.memory_space<vmem>>, vector<2x128xf32>
    tpu.vector_store %arg6[%c0_52, %c0_53], %273 {strides = array<i32>} : memref<2x128xf32, #tpu.memory_space<vmem>>, vector<2x128xf32>,
    return
  }
}

</mosaic_0001>

<bundles_post_ra>
// kernel: tpu_custom_call.1
= control target key start
LH: loop header
LB: loop body
LE: loop exit
PB: predicated region body
PF: predicated region fallthrough
CT: control target
= control target key end

     0   :  { %11 = vsyncpa [#allocation3], 0  ;;  %s1746_s0 = inlined_call_operand.hbm [shape: f32[2,8], index: 0, kind: input, shape index: {}]   ;;  %s1747_s1 = inlined_call_operand.vmem [shape: f32[1,256], index: 1, kind: input, shape index: {}]   ;;  %s1748_s2 = inlined_call_operand.hbm [shape: f32[64,256], index: 2, kind: input, shape index: {}]   ;;  %s1749_s3 = inlined_call_operand.vmem [shape: f32[1,256], index: 3, kind: input, shape index: {}]   ;;  %s1750_s4 = inlined_call_operand.hbm [shape: f32[64,128], index: 4, kind: input, shape index: {}]   ;;  %s1751_s5 = inlined_call_operand.vmem [shape: f32[1,128], index: 5, kind: input, shape index: {}]   ;;  %s1752_s6 = inlined_call_operand.hbm [shape: f32[2,128], index: 6, kind: output, shape index: {}]  }
   0x1   :  { %12 = vsyncpa [#allocation6], 0 }
   0x2   :  { %13 = vsyncpa [#allocation4], 0  ;;  %s1470_s21 = smov [#allocation5]   ;;  %s1376_s25 = scalar_lea.hbm %s1748_s2, 2048 }
   0x3   :  { %s31_s22 = sshll.u32 %s1470_s21, 4  ;;  %p1377_p0 = scmp.ne.s32.totalorder %s1748_s2, %s1376_s25  ;;  %s32_s22 = int_to_ptr.vmem [resolvable:$true] %s31_s22 }
   0x4   :  { %p1380_p1 = scmp.lt.u32.totalorder %s1376_s25, %s1748_s2 }
   0x6   :  { %p1382_p2 = pnand %p1380_p1, %p1377_p0 }
   0x8   :  { %1385 = shalt.err (!%p1382_p2)
}
   0x9   :  { %s1386_s30 = scalar_lea.vmem %s32_s22, 2048  ;;  %p1391_p4 = scmp.lt.s32.totalorder %s32_s22, %s32_s22 }
   0xa   :  { %p1387_p3 = scmp.ne.s32.totalorder %s32_s22, %s1386_s30  ;;  %p1392_p5 = scmp.lt.s32.totalorder %s1386_s30, %s1386_s30 }
   0xc   :  { %p1393_p6 = por %p1392_p5, %p1391_p4 }
   0xe   :  { %p1394_p7 = pnand %p1393_p6, %p1387_p3 }
  0x10   :  { %1397 = shalt.err (!%p1394_p7)
}
  0x11   :  { %s1471_s7 = smov 256   ;;  %s1472_s8 = smov 16  }
  0x12   :  { %37 = dma.hbm_to_vmem [thread:$0]  %s1748_s2, 2048, %s32_s22, [#allocation6], %s1471_s7, %s1471_s7, %s1472_s8  }
  0x13   :  { %s1473_s11 = smov [#allocation2]   ;;  %s1474_s13 = smov [#allocation7]  }
  0x14   :  { %s20_s12 = sshll.u32 %s1473_s11, 4  ;;  %s45_s14 = sshll.u32 %s1474_s13, 4  ;;  %s21_s12 = int_to_ptr.vmem [resolvable:$true] %s20_s12  ;;  %s46_s14 = int_to_ptr.vmem [resolvable:$true] %s45_s14 }
  0x15   :  { %s1398_s17 = scalar_lea.hbm %s1746_s0, 32 }
  0x16   :  { %p1399_p8 = scmp.ne.s32.totalorder %s1746_s0, %s1398_s17  ;;  %p1402_p9 = scmp.lt.u32.totalorder %s1398_s17, %s1746_s0 }
  0x18   :  { %p1404_p10 = pnand %p1402_p9, %p1399_p8 }
  0x1a   :  { %1407 = shalt.err (!%p1404_p10)
}
  0x1b   :  { %s1408_s2 = scalar_lea.vmem %s21_s12, 32  ;;  %p1413_p12 = scmp.lt.s32.totalorder %s21_s12, %s21_s12 }
  0x1c   :  { %p1409_p11 = scmp.ne.s32.totalorder %s21_s12, %s1408_s2  ;;  %p1414_p13 = scmp.lt.s32.totalorder %s1408_s2, %s1408_s2 }
  0x1e   :  { %p1415_p0 = por %p1414_p13, %p1413_p12 }
  0x20   :  { %p1416_p1 = pnand %p1415_p0, %p1409_p11 }
  0x22   :  { %1419 = shalt.err (!%p1416_p1)
}
  0x23   :  { %23 = dma.hbm_to_vmem [thread:$0]  %s1746_s0, 32, %s21_s12, [#allocation3]  }
  0x24   :  { %s1420_s26 = scalar_lea.hbm %s1750_s4, 1024 }
  0x25   :  { %p1421_p2 = scmp.ne.s32.totalorder %s1750_s4, %s1420_s26  ;;  %p1424_p3 = scmp.lt.u32.totalorder %s1420_s26, %s1750_s4 }
  0x27   :  { %p1426_p4 = pnand %p1424_p3, %p1421_p2 }
  0x29   :  { %1429 = shalt.err (!%p1426_p4)
}
  0x2a   :  { %s1430_s7 = scalar_lea.vmem %s46_s14, 1024  ;;  %p1435_p6 = scmp.lt.s32.totalorder %s46_s14, %s46_s14 }
  0x2b   :  { %p1431_p5 = scmp.ne.s32.totalorder %s46_s14, %s1430_s7  ;;  %p1436_p7 = scmp.lt.s32.totalorder %s1430_s7, %s1430_s7 }
  0x2d   :  { %p1437_p8 = por %p1436_p7, %p1435_p6 }
  0x2f   :  { %p1438_p9 = pnand %p1437_p8, %p1431_p5 }
  0x31   :  { %1441 = shalt.err (!%p1438_p9)
}
  0x32   :  { %s1475_s0 = smov 128   ;;  %s1476_s8 = smov 8  }
  0x33   :  { %51 = dma.hbm_to_vmem [thread:$0]  %s1750_s4, 1024, %s46_s14, [#allocation6], %s1475_s0, %s1475_s0, %s1476_s8  }
  0x34   :  { %1464 = dma.done.wait [#allocation3], 32  }
  0x35   :  { %1465 = vsyncadd [#allocation3], 4294967264 }
  0x36   :  { %1466 = dma.done.wait [#allocation6], 3072  }
  0x37   :  { %1467 = vsyncadd [#allocation6], 4294964224  ;;  %v1477_v0 = vmov 0.0   ;;  %v1478_v1 = vmov 0   ;;  %v64_v2 = vld [vmem:[#allocation5 + $0x8] sm:$0xff]  ;;  %v66_v3 = vld [vmem:[#allocation5 + $0x18] sm:$0xff]  ;;  %v88_v27 = vlaneseq }
  0x38   :  { %181 = vmatprep.mubr.f32.mxu0 %v1477_v0  ;;  %1272 = vset.pattern.permute.xlu0 %v1478_v1  ;;  %v63_v4 = vld [vmem:[#allocation5] sm:$0xff]  ;;  %v1563_v5 = vpack.c.bf16 %v66_v3, %v64_v2  ;;  %v65_v6 = vld [vmem:[#allocation5 + $0x10] sm:$0xff]  ;;  %v68_v7 = vld [vmem:[#allocation5 + $0x28] sm:$0xff]  ;;  %v1480_v58 = vmov 1   ;;  %vm113_vm0 = vcmask 523264   ;;  %vm1488_vm1 = vmmov 0  }
  0x39   :  { %287 = vmatprep.mubr.f32.mxu1 %v1477_v0  ;;  %v70_v8 = vld [vmem:[#allocation5 + $0x38] sm:$0xff]  ;;  %v1565_v9 = vpack.c.bf16 %v65_v6, %v63_v4  ;;  %v67_v11 = vld [vmem:[#allocation5 + $0x20] sm:$0xff]  ;;  %v69_v12 = vld [vmem:[#allocation5 + $0x30] sm:$0xff]  ;;  %v89_v28 = vshrl.u32 %v88_v27, 7  ;;  %1273 = vset.pattern.permute.xlu1 %v1480_v58  ;;  %s1489_s15 = smov [#allocation8]  }
  0x3a   :  { %v1567_v10 = vpack.c.bf16 %v70_v8, %v68_v7  ;;  %v72_v13 = vld [vmem:[#allocation5 + $0x48] sm:$0xff]  ;;  %1113 = vmatprep.subr.bf16.mxu0 %v1563_v5  ;;  %v74_v14 = vld [vmem:[#allocation5 + $0x58] sm:$0xff]  ;;  %1129 = vmatprep.subr.bf16.mxu1 %v1563_v5  ;;  %v1572_v15 = vpack.c.bf16 %v69_v12, %v67_v11  ;;  %v71_v17 = vld [vmem:[#allocation5 + $0x40] sm:$0xff]  ;;  %s1049_s16 = sshll.u32 %s1489_s15, 4  ;;  %s1050_s16 = int_to_ptr.vmem [resolvable:$true] %s1049_s16 }
  0x3b   :  { %1115 = vmatpush1.bf16.msra.mxu0 %v1565_v9  ;;  %1131 = vmatpush1.bf16.msra.mxu1 %v1565_v9  ;;  %v1576_v16 = vpack.c.bf16 %v74_v14, %v72_v13  ;;  %v73_v18 = vld [vmem:[#allocation5 + $0x50] sm:$0xff]  ;;  %v1578_v19 = vld [vmem:[#allocation2] sm:$0x3]  ;;  %v76_v20 = vld [vmem:[#allocation5 + $0x68] sm:$0xff]  ;;  %v90_v29 = vsub.s32 0, %v89_v28  ;;  %v94_v36 = vsub.s32 1, %v89_v28  ;;  %p1447_p11 = scmp.lt.s32.totalorder %s1050_s16, %s1050_s16 }
  0x3c   :  { %1117 = vmatprep.subr.bf16.mxu0 %v1567_v10  ;;  %1133 = vmatprep.subr.bf16.mxu1 %v1567_v10  ;;  %v78_v21 = vld [vmem:[#allocation5 + $0x78] sm:$0xff]  ;;  %v1583_v22 = vpack.c.bf16 %v73_v18, %v71_v17  ;;  %v75_v24 = vld [vmem:[#allocation5 + $0x60] sm:$0xff]  ;;  %v77_v25 = vld [vmem:[#allocation5 + $0x70] sm:$0xff]  ;;  %s1442_s17 = scalar_lea.vmem %s1050_s16, 32 }
  0x3d   :  { %84 = vperm.xlu0 %1272, %v1578_v19   ;;  %v1587_v23 = vpack.c.bf16 %v78_v21, %v76_v20  ;;  %v1591_v26 = vpack.c.bf16 %v77_v25, %v75_v24  ;;  %v79_v30 = vld [vmem:[%s1747_s1] sm:$0x3]  ;;  %s1479_s1 = smov 64   ;;  %p1443_p10 = scmp.ne.s32.totalorder %s1050_s16, %s1442_s17 }
  0x3e   :  { %v1613_v31 = vrot.slane %v79_v30, %v90_v29  ;;  %v80_v33 = vld [vmem:[%s1749_s3] sm:$0x3]  ;;  %v1622_v39 = vrot.slane %v79_v30, %v94_v36  ;;  %v1481_v30 = vmov 2   ;;  %p1448_p12 = scmp.lt.s32.totalorder %s1442_s17, %s1442_s17 }
  0x3f   :  { %1119 = vmatpush1.bf16.msra.mxu0 %v1572_v15  ;;  %1135 = vmatpush1.bf16.msra.mxu1 %v1572_v15  ;;  %v1619_v35 = vrot.slane %v80_v33, %v90_v29  ;;  %v1625_v44 = vrot.slane %v80_v33, %v94_v36 }
  0x40   :  { %1121 = vmatprep.subr.bf16.mxu0 %v1576_v16  ;;  %1137 = vmatprep.subr.bf16.mxu1 %v1576_v16  ;;  %p1449_p13 = por %p1448_p12, %p1447_p11 }
  0x41   :  { %1274 = vset.pattern.permute.xlu0 %v1481_v30 }
  0x42   :  { %p1450_p0 = pnand %p1449_p13, %p1443_p10 }
  0x43   :  { %1123 = vmatpush1.bf16.msra.mxu0 %v1583_v22  ;;  %1139 = vmatpush1.bf16.msra.mxu1 %v1583_v22 }
  0x44   :  { %1125 = vmatprep.subr.bf16.mxu0 %v1587_v23  ;;  %1141 = vmatprep.subr.bf16.mxu1 %v1587_v23 }
  0x47   :  { %1127 = vmatpush1.bf16.msra.mxu0 %v1591_v26  ;;  %1143 = vmatpush1.bf16.msra.mxu1 %v1591_v26 }
  0x48   :  { %1145 = vmatprep.subr.bf16.mxu0 %v1563_v5  ;;  %1161 = vmatprep.subr.bf16.mxu1 %v1563_v5 }
  0x4a   :  { %182 = vmatmul.mubr.f32.vlgmr.msra.gmra.mrb[0].mxu0 %v1477_v0 }
  0x4b   :  { %1147 = vmatpush1.bf16.msra.mxu0 %v1565_v9  ;;  %393 = vmatprep.mubr.f32.mxu0 %v1477_v0 }
  0x4c   :  { %1149 = vmatprep.subr.bf16.mxu0 %v1567_v10 }
  0x4f   :  { %1151 = vmatpush1.bf16.msra.mxu0 %v1572_v15 }
  0x50   :  { %1153 = vmatprep.subr.bf16.mxu0 %v1576_v16 }
  0x53   :  { %1155 = vmatpush1.bf16.msra.mxu0 %v1583_v22 }
  0x54   :  { %1157 = vmatprep.subr.bf16.mxu0 %v1587_v23 }
  0x57   :  { %1159 = vmatpush1.bf16.msra.mxu0 %v1591_v26 }
  0x58   :  { %1177 = vmatprep.subr.bf16.mxu0 %v1563_v5 }
  0xbc   :  { %v85_v32 = vpop.permute.xlu0 %84 }
  0xbd   :  { %v98_v34 = vmul.f32 %v1613_v31, %v85_v32  ;;  %v99_v43 = vmul.f32 %v1622_v39, %v85_v32 }
  0xbf   :  { %v111_v37 = vadd.f32 %v1619_v35, %v98_v34  ;;  %v112_v45 = vadd.f32 %v1625_v44, %v99_v43 }
 0x11d   :  { %v183_v38 = vpop.f32.mrb[0].mxu0 }
 0x11e   :  { %v184_v40 = vadd.f32 %v183_v38, %v111_v37  ;;  %v185_v41 = vpop.f32.mrb[1].mxu0 }
 0x11f   :  { %v186_v46 = vadd.f32 %v185_v41, %v112_v45 }
 0x120   :  { %v1059_v42 = vmul.f32 -1.442695, %v184_v40 }
 0x121   :  { %v1060_v52 = vmul.f32 -1.442695, %v186_v46 }
 0x122   :  { %1280 = vpow2.f32 %v1059_v42 }
 0x123   :  { %1282 = vtanh.f32 %v186_v46 }
 0x12c   :  { %v1281_v47 = vpop.eup %1280 }
 0x12d   :  { %v191_v48 = vadd.f32 1.0, %v1281_v47  ;;  %v1283_v49 = vpop.eup %1282 }
 0x12f   :  { %1284 = vrcp.f32 %v191_v48 }
 0x130   :  { %1286 = vpow2.f32 %v1060_v52 }
 0x139   :  { %v1285_v50 = vpop.eup %1284 }
 0x13a   :  { %v202_v51 = vmul.f32 %v1285_v50, %v1283_v49  ;;  %v1287_v53 = vpop.eup %1286  ;;  %v201_v55 = vmul.f32 0.0, %v1285_v50 }
 0x13b   :  { %v198_v54 = vadd.f32 1.0, %v1287_v53 }
 0x13c   :  { %204 = vrot.lane.b32.xlu0 %v202_v51, %s1479_s1 }
 0x13d   :  { %1288 = vrcp.f32 %v198_v54 }
 0x147   :  { %v1289_v59 = vpop.eup %1288 }
 0x1ae   :  { %v205_v56 = vpop.permute.xlu0 %204 }
 0x1af   :  { %v207_v57 = vadd.f32 %v205_v56, %v201_v55 }
 0x1b1   :  { %1290 = vtanh.f32 %v207_v57 }
 0x1bb   :  { %v1291_v60 = vpop.eup %1290 }
 0x1bc   :  { %v209_v61 = vmul.f32 %v1291_v60, %v1289_v59  ;;  %v1482_v60 = vmov 3  }
 0x1be   :  { %219 = vrot.lane.b32.xlu1 %v209_v61, %s1479_s1 }
 0x1c2   :  { %211 = vperm.xlu1 %1273, %v1578_v19  }
 0x230   :  { %v220_v62 = vpop.permute.xlu1 %219 }
 0x231   :  { %1061 = vmatmul.mubr.msk.f32.vlgmr.msra.gmra.mrb[0].mxu1 %vm113_vm0, %v220_v62 }
 0x232   :  { %1163 = vmatpush1.bf16.msra.mxu1 %v1565_v9  ;;  %499 = vmatprep.mubr.f32.mxu1 %v1477_v0 }
 0x233   :  { %1165 = vmatprep.subr.bf16.mxu1 %v1567_v10 }
 0x236   :  { %1167 = vmatpush1.bf16.msra.mxu1 %v1572_v15 }
 0x237   :  { %1169 = vmatprep.subr.bf16.mxu1 %v1576_v16 }
 0x23a   :  { %1171 = vmatpush1.bf16.msra.mxu1 %v1583_v22 }
 0x23b   :  { %1173 = vmatprep.subr.bf16.mxu1 %v1587_v23 }
 0x23e   :  { %1175 = vmatpush1.bf16.msra.mxu1 %v1591_v26 }
 0x23f   :  { %1193 = vmatprep.subr.bf16.mxu1 %v1563_v5 }
 0x241   :  { %v212_v63 = vpop.permute.xlu1 %211 }
 0x242   :  { %v214_v1 = vmul.f32 %v212_v63, %v1613_v31  ;;  %v215_v8 = vmul.f32 %v212_v63, %v1622_v39 }
 0x244   :  { %v216_v2 = vadd.f32 %v214_v1, %v1619_v35  ;;  %v217_v11 = vadd.f32 %v215_v8, %v1625_v44 }
 0x304   :  { %v289_v3 = vpop.f32.mrb[0].mxu1 }
 0x305   :  { %v290_v4 = vadd.f32 %v289_v3, %v216_v2  ;;  %v291_v6 = vpop.f32.mrb[1].mxu1 }
 0x306   :  { %v292_v12 = vadd.f32 %v291_v6, %v217_v11 }
 0x307   :  { %v1062_v7 = vmul.f32 -1.442695, %v290_v4 }
 0x308   :  { %v1063_v21 = vmul.f32 -1.442695, %v292_v12 }
 0x309   :  { %1292 = vpow2.f32 %v1062_v7 }
 0x30a   :  { %1294 = vtanh.f32 %v292_v12 }
 0x313   :  { %v1293_v13 = vpop.eup %1292 }
 0x314   :  { %v297_v14 = vadd.f32 1.0, %v1293_v13  ;;  %v1295_v17 = vpop.eup %1294 }
 0x316   :  { %1296 = vrcp.f32 %v297_v14 }
 0x317   :  { %1298 = vpow2.f32 %v1063_v21 }
 0x320   :  { %v1297_v18 = vpop.eup %1296 }
 0x321   :  { %v308_v20 = vmul.f32 %v1297_v18, %v1295_v17  ;;  %v1299_v24 = vpop.eup %1298  ;;  %v307_v27 = vmul.f32 %v1297_v18, %v207_v57 }
 0x322   :  { %v304_v25 = vadd.f32 1.0, %v1299_v24 }
 0x323   :  { %310 = vrot.lane.b32.xlu0 %v308_v20, %s1479_s1 }
 0x324   :  { %1300 = vrcp.f32 %v304_v25 }
 0x327   :  { %317 = vperm.xlu0 %1274, %v1578_v19  }
 0x32b   :  { %1275 = vset.pattern.permute.xlu0 %v1482_v60 }
 0x32c   :  { %423 = vperm.xlu0 %1275, %v1578_v19  }
 0x32e   :  { %v1301_v32 = vpop.eup %1300 }
 0x395   :  { %v311_v28 = vpop.permute.xlu0 %310 }
 0x396   :  { %v313_v29 = vadd.f32 %v311_v28, %v307_v27 }
 0x398   :  { %1302 = vtanh.f32 %v313_v29 }
 0x3a2   :  { %v1303_v33 = vpop.eup %1302 }
 0x3a3   :  { %v315_v34 = vmul.f32 %v1303_v33, %v1301_v32  ;;  %v1483_v32 = vmov 4  }
 0x3a4   :  { %1276 = vset.pattern.permute.xlu0 %v1483_v32 }
 0x3a5   :  { %325 = vrot.lane.b32.xlu1 %v315_v34, %s1479_s1  ;;  %529 = vperm.xlu0 %1276, %v1578_v19  }
 0x3a6   :  { %v318_v37 = vpop.permute.xlu0 %317 }
 0x3a7   :  { %v320_v38 = vmul.f32 %v318_v37, %v1613_v31  ;;  %v321_v46 = vmul.f32 %v318_v37, %v1622_v39 }
 0x3a9   :  { %v322_v40 = vadd.f32 %v320_v38, %v1619_v35  ;;  %v323_v47 = vadd.f32 %v321_v46, %v1625_v44 }
 0x3ab   :  { %v424_v2 = vpop.permute.xlu0 %423 }
 0x3ac   :  { %v426_v3 = vmul.f32 %v424_v2, %v1613_v31  ;;  %v427_v12 = vmul.f32 %v424_v2, %v1622_v39 }
 0x3ae   :  { %v428_v4 = vadd.f32 %v426_v3, %v1619_v35  ;;  %v429_v13 = vadd.f32 %v427_v12, %v1625_v44 }
 0x417   :  { %v326_v36 = vpop.permute.xlu1 %325 }
 0x418   :  { %1064 = vmatmul.mubr.msk.f32.vlgmr.msra.gmra.mrb[2].mxu0 %vm113_vm0, %v326_v36 }
 0x419   :  { %1179 = vmatpush1.bf16.msra.mxu0 %v1565_v9  ;;  %605 = vmatprep.mubr.f32.mxu0 %v1477_v0 }
 0x41a   :  { %1181 = vmatprep.subr.bf16.mxu0 %v1567_v10 }
 0x41d   :  { %1183 = vmatpush1.bf16.msra.mxu0 %v1572_v15 }
 0x41e   :  { %1185 = vmatprep.subr.bf16.mxu0 %v1576_v16 }
 0x421   :  { %1187 = vmatpush1.bf16.msra.mxu0 %v1583_v22 }
 0x422   :  { %1189 = vmatprep.subr.bf16.mxu0 %v1587_v23 }
 0x424   :  { %v530_v38 = vpop.permute.xlu0 %529 }
 0x425   :  { %1191 = vmatpush1.bf16.msra.mxu0 %v1591_v26 }
 0x426   :  { %1209 = vmatprep.subr.bf16.mxu0 %v1563_v5 }
 0x4eb   :  { %v395_v41 = vpop.f32.mrb[2].mxu0 }
 0x4ec   :  { %v396_v42 = vadd.f32 %v395_v41, %v322_v40  ;;  %v397_v43 = vpop.f32.mrb[3].mxu0  ;;  %v532_v40 = vmul.f32 %v530_v38, %v1613_v31 }
 0x4ed   :  { %v398_v48 = vadd.f32 %v397_v43, %v323_v47  ;;  %v533_v47 = vmul.f32 %v530_v38, %v1622_v39 }
 0x4ee   :  { %v1065_v45 = vmul.f32 -1.442695, %v396_v42  ;;  %v534_v41 = vadd.f32 %v532_v40, %v1619_v35 }
 0x4ef   :  { %v1066_v54 = vmul.f32 -1.442695, %v398_v48 }
 0x4f0   :  { %1304 = vpow2.f32 %v1065_v45 }
 0x4f1   :  { %1306 = vtanh.f32 %v398_v48  ;;  %v535_v48 = vadd.f32 %v533_v47, %v1625_v44 }
 0x4fa   :  { %v1305_v49 = vpop.eup %1304 }
 0x4fb   :  { %v403_v50 = vadd.f32 1.0, %v1305_v49  ;;  %v1307_v51 = vpop.eup %1306 }
 0x4fd   :  { %1308 = vrcp.f32 %v403_v50 }
 0x4fe   :  { %1310 = vpow2.f32 %v1066_v54 }
 0x507   :  { %v1309_v52 = vpop.eup %1308 }
 0x508   :  { %v414_v53 = vmul.f32 %v1309_v52, %v1307_v51  ;;  %v1311_v55 = vpop.eup %1310  ;;  %v413_v57 = vmul.f32 %v1309_v52, %v313_v29 }
 0x509   :  { %v410_v56 = vadd.f32 1.0, %v1311_v55 }
 0x50a   :  { %416 = vrot.lane.b32.xlu1 %v414_v53, %s1479_s1 }
 0x50b   :  { %1312 = vrcp.f32 %v410_v56 }
 0x515   :  { %v1313_v61 = vpop.eup %1312 }
 0x57c   :  { %v417_v58 = vpop.permute.xlu1 %416 }
 0x57d   :  { %v419_v59 = vadd.f32 %v417_v58, %v413_v57 }
 0x57f   :  { %1314 = vtanh.f32 %v419_v59 }
 0x589   :  { %v1315_v62 = vpop.eup %1314 }
 0x58a   :  { %v421_v63 = vmul.f32 %v1315_v62, %v1313_v61  ;;  %v1484_v61 = vmov 5  }
 0x58b   :  { %1277 = vset.pattern.permute.xlu0 %v1484_v61 }
 0x58c   :  { %431 = vrot.lane.b32.xlu1 %v421_v63, %s1479_s1  ;;  %635 = vperm.xlu0 %1277, %v1578_v19  }
 0x5fe   :  { %v432_v1 = vpop.permute.xlu1 %431 }
 0x5ff   :  { %1067 = vmatmul.mubr.msk.f32.vlgmr.msra.gmra.mrb[2].mxu1 %vm113_vm0, %v432_v1 }
 0x600   :  { %1195 = vmatpush1.bf16.msra.mxu1 %v1565_v9  ;;  %711 = vmatprep.mubr.f32.mxu1 %v1477_v0 }
 0x601   :  { %1197 = vmatprep.subr.bf16.mxu1 %v1567_v10 }
 0x604   :  { %1199 = vmatpush1.bf16.msra.mxu1 %v1572_v15 }
 0x605   :  { %1201 = vmatprep.subr.bf16.mxu1 %v1576_v16 }
 0x608   :  { %1203 = vmatpush1.bf16.msra.mxu1 %v1583_v22 }
 0x609   :  { %1205 = vmatprep.subr.bf16.mxu1 %v1587_v23 }
 0x60b   :  { %v636_v3 = vpop.permute.xlu0 %635 }
 0x60c   :  { %1207 = vmatpush1.bf16.msra.mxu1 %v1591_v26 }
 0x60d   :  { %1225 = vmatprep.subr.bf16.mxu1 %v1563_v5 }
 0x6d2   :  { %v501_v6 = vpop.f32.mrb[2].mxu1 }
 0x6d3   :  { %v502_v7 = vadd.f32 %v501_v6, %v428_v4  ;;  %v503_v8 = vpop.f32.mrb[3].mxu1  ;;  %v638_v4 = vmul.f32 %v636_v3, %v1613_v31 }
 0x6d4   :  { %v504_v14 = vadd.f32 %v503_v8, %v429_v13 }
 0x6d5   :  { %v1068_v11 = vmul.f32 -1.442695, %v502_v7  ;;  %v640_v6 = vadd.f32 %v638_v4, %v1619_v35 }
 0x6d6   :  { %v1069_v24 = vmul.f32 -1.442695, %v504_v14 }
 0x6d7   :  { %1316 = vpow2.f32 %v1068_v11 }
 0x6d8   :  { %1318 = vtanh.f32 %v504_v14 }
 0x6e1   :  { %v1317_v17 = vpop.eup %1316 }
 0x6e2   :  { %v509_v18 = vadd.f32 1.0, %v1317_v17  ;;  %v1319_v5 = vpop.eup %1318 }
 0x6e4   :  { %1320 = vrcp.f32 %v509_v18 }
 0x6e5   :  { %1322 = vpow2.f32 %v1069_v24  ;;  %v1485_v24 = vmov 6  }
 0x6e6   :  { %1278 = vset.pattern.permute.xlu0 %v1485_v24 }
 0x6e7   :  { %741 = vperm.xlu0 %1278, %v1578_v19  }
 0x6ee   :  { %v1321_v20 = vpop.eup %1320 }
 0x6ef   :  { %v520_v21 = vmul.f32 %v1321_v20, %v1319_v5  ;;  %v1323_v25 = vpop.eup %1322  ;;  %v519_v28 = vmul.f32 %v1321_v20, %v419_v59 }
 0x6f0   :  { %v516_v27 = vadd.f32 1.0, %v1323_v25 }
 0x6f1   :  { %522 = vrot.lane.b32.xlu1 %v520_v21, %s1479_s1 }
 0x6f2   :  { %1324 = vrcp.f32 %v516_v27 }
 0x6fc   :  { %v1325_v33 = vpop.eup %1324 }
 0x763   :  { %v523_v29 = vpop.permute.xlu1 %522 }
 0x764   :  { %v525_v30 = vadd.f32 %v523_v29, %v519_v28 }
 0x766   :  { %1326 = vtanh.f32 %v525_v30 }
 0x770   :  { %v1327_v34 = vpop.eup %1326 }
 0x771   :  { %v527_v36 = vmul.f32 %v1327_v34, %v1325_v33 }
 0x773   :  { %537 = vrot.lane.b32.xlu1 %v527_v36, %s1479_s1 }
 0x7e5   :  { %v538_v37 = vpop.permute.xlu1 %537 }
 0x7e6   :  { %1070 = vmatmul.mubr.msk.f32.vlgmr.msra.gmra.mrb[4].mxu0 %vm113_vm0, %v538_v37 }
 0x7e7   :  { %1211 = vmatpush1.bf16.msra.mxu0 %v1565_v9  ;;  %817 = vmatprep.mubr.f32.mxu0 %v1477_v0 }
 0x7e8   :  { %1213 = vmatprep.subr.bf16.mxu0 %v1567_v10 }
 0x7eb   :  { %1215 = vmatpush1.bf16.msra.mxu0 %v1572_v15 }
 0x7ec   :  { %1217 = vmatprep.subr.bf16.mxu0 %v1576_v16 }
 0x7ef   :  { %1219 = vmatpush1.bf16.msra.mxu0 %v1583_v22 }
 0x7f0   :  { %1221 = vmatprep.subr.bf16.mxu0 %v1587_v23 }
 0x7f3   :  { %1223 = vmatpush1.bf16.msra.mxu0 %v1591_v26 }
 0x8b9   :  { %v607_v42 = vpop.f32.mrb[4].mxu0 }
 0x8ba   :  { %v608_v43 = vadd.f32 %v607_v42, %v534_v41  ;;  %v609_v45 = vpop.f32.mrb[5].mxu0 }
 0x8bb   :  { %v610_v49 = vadd.f32 %v609_v45, %v535_v48 }
 0x8bc   :  { %v1071_v46 = vmul.f32 -1.442695, %v608_v43 }
 0x8bd   :  { %v1072_v55 = vmul.f32 -1.442695, %v610_v49 }
 0x8be   :  { %1328 = vpow2.f32 %v1071_v46 }
 0x8bf   :  { %1330 = vtanh.f32 %v610_v49 }
 0x8c8   :  { %v1329_v50 = vpop.eup %1328 }
 0x8c9   :  { %v615_v51 = vadd.f32 1.0, %v1329_v50  ;;  %v1331_v52 = vpop.eup %1330 }
 0x8cb   :  { %1332 = vrcp.f32 %v615_v51 }
 0x8cc   :  { %1334 = vpow2.f32 %v1072_v55  ;;  %v1486_v55 = vmov 7  }
 0x8cd   :  { %1279 = vset.pattern.permute.xlu0 %v1486_v55 }
 0x8ce   :  { %847 = vperm.xlu0 %1279, %v1578_v19  }
 0x8d5   :  { %v1333_v53 = vpop.eup %1332 }
 0x8d6   :  { %v626_v54 = vmul.f32 %v1333_v53, %v1331_v52  ;;  %v1335_v56 = vpop.eup %1334  ;;  %v625_v58 = vmul.f32 %v1333_v53, %v525_v30  ;;  %v742_v30 = vpop.permute.xlu0 %741 }
 0x8d7   :  { %v622_v57 = vadd.f32 1.0, %v1335_v56  ;;  %v744_v32 = vmul.f32 %v742_v30, %v1613_v31  ;;  %v745_v40 = vmul.f32 %v742_v30, %v1622_v39  ;;  %v1082_v30 = vld [vmem:[%s1751_s5] ss:$0 sm:$0xff] }
 0x8d8   :  { %628 = vrot.lane.b32.xlu1 %v626_v54, %s1479_s1 }
 0x8d9   :  { %1336 = vrcp.f32 %v622_v57  ;;  %v746_v33 = vadd.f32 %v744_v32, %v1619_v35  ;;  %v747_v41 = vadd.f32 %v745_v40, %v1625_v44 }
 0x8e3   :  { %v1337_v62 = vpop.eup %1336 }
 0x94a   :  { %v629_v59 = vpop.permute.xlu1 %628 }
 0x94b   :  { %v631_v60 = vadd.f32 %v629_v59, %v625_v58 }
 0x94d   :  { %1338 = vtanh.f32 %v631_v60 }
 0x957   :  { %v1339_v63 = vpop.eup %1338 }
 0x958   :  { %v633_v1 = vmul.f32 %v1339_v63, %v1337_v62 }
 0x95a   :  { %643 = vrot.lane.b32.xlu1 %v633_v1, %s1479_s1 }
 0x9cc   :  { %v644_v2 = vpop.permute.xlu1 %643 }
 0x9cd   :  { %1073 = vmatmul.mubr.msk.f32.vlgmr.msra.gmra.mrb[4].mxu1 %vm113_vm0, %v644_v2 }
 0x9ce   :  { %1227 = vmatpush1.bf16.msra.mxu1 %v1565_v9  ;;  %923 = vmatprep.mubr.f32.mxu1 %v1477_v0 }
 0x9cf   :  { %1229 = vmatprep.subr.bf16.mxu1 %v1567_v10  ;;  %v639_v10 = vmul.f32 %v636_v3, %v1622_v39 }
 0x9d2   :  { %1231 = vmatpush1.bf16.msra.mxu1 %v1572_v15  ;;  %v641_v15 = vadd.f32 %v639_v10, %v1625_v44 }
 0x9d3   :  { %1233 = vmatprep.subr.bf16.mxu1 %v1576_v16 }
 0x9d6   :  { %1235 = vmatpush1.bf16.msra.mxu1 %v1583_v22 }
 0x9d7   :  { %1237 = vmatprep.subr.bf16.mxu1 %v1587_v23 }
 0x9da   :  { %1239 = vmatpush1.bf16.msra.mxu1 %v1591_v26 }
 0xaa0   :  { %v713_v9 = vpop.f32.mrb[4].mxu1 }
 0xaa1   :  { %v714_v7 = vadd.f32 %v713_v9, %v640_v6  ;;  %v715_v8 = vpop.f32.mrb[5].mxu1 }
 0xaa2   :  { %v716_v16 = vadd.f32 %v715_v8, %v641_v15  ;;  %v954_v15 = vld [vmem:[#allocation7 + $0x10] sm:$0xff] }
 0xaa3   :  { %v1074_v11 = vmul.f32 -1.442695, %v714_v7 }
 0xaa4   :  { %v1075_v14 = vmul.f32 -1.442695, %v716_v16 }
 0xaa5   :  { %1340 = vpow2.f32 %v1074_v11 }
 0xaa6   :  { %1342 = vtanh.f32 %v716_v16  ;;  %v1487_v16 = vmov 0.0|0.0  }
 0xaa7   :  { %1240 = vmatprep.subr.bf16.mxu0 %v1487_v16 }
 0xaaf   :  { %v1341_v22 = vpop.eup %1340 }
 0xab0   :  { %v721_v12 = vadd.f32 1.0, %v1341_v22  ;;  %v1343_v23 = vpop.eup %1342 }
 0xab2   :  { %1344 = vrcp.f32 %v721_v12  ;;  %v956_v12 = vld [vmem:[#allocation7 + $0x20] sm:$0xff] }
 0xab3   :  { %1346 = vpow2.f32 %v1075_v14  ;;  %v959_v14 = vld [vmem:[#allocation7 + $0x38] sm:$0xff] }
 0xabc   :  { %v1345_v26 = vpop.eup %1344 }
 0xabd   :  { %v732_v13 = vmul.f32 %v1345_v26, %v1343_v23  ;;  %v1347_v17 = vpop.eup %1346  ;;  %v731_v5 = vmul.f32 %v1345_v26, %v631_v60  ;;  %v848_v60 = vpop.permute.xlu0 %847  ;;  %v957_v23 = vld [vmem:[#allocation7 + $0x28] sm:$0xff] }
 0xabe   :  { %v728_v18 = vadd.f32 1.0, %v1347_v17  ;;  %v850_v61 = vmul.f32 %v848_v60, %v1613_v31  ;;  %v851_v4 = vmul.f32 %v848_v60, %v1622_v39  ;;  %v952_v31 = vld [vmem:[#allocation7] sm:$0xff]  ;;  %v955_v39 = vld [vmem:[#allocation7 + $0x18] sm:$0xff]  ;;  %v1247_v26 = vpack.c.bf16 %v957_v23, %v956_v12 }
 0xabf   :  { %734 = vrot.lane.b32.xlu1 %v732_v13, %s1479_s1  ;;  %v958_v13 = vld [vmem:[#allocation7 + $0x30] sm:$0xff] }
 0xac0   :  { %1348 = vrcp.f32 %v728_v18  ;;  %v852_v62 = vadd.f32 %v850_v61, %v1619_v35  ;;  %v853_v19 = vadd.f32 %v851_v4, %v1625_v44  ;;  %v953_v35 = vld [vmem:[#allocation7 + $0x8] sm:$0xff]  ;;  %v1244_v44 = vpack.c.bf16 %v955_v39, %v954_v15 }
 0xac1   :  { %v1241_v22 = vpack.c.bf16 %v953_v35, %v952_v31  ;;  %v1250_v17 = vpack.c.bf16 %v959_v14, %v958_v13 }
 0xaca   :  { %v1349_v25 = vpop.eup %1348 }
 0xb31   :  { %v735_v20 = vpop.permute.xlu1 %734 }
 0xb32   :  { %v737_v21 = vadd.f32 %v735_v20, %v731_v5 }
 0xb34   :  { %1350 = vtanh.f32 %v737_v21 }
 0xb3e   :  { %v1351_v27 = vpop.eup %1350 }
 0xb3f   :  { %v739_v28 = vmul.f32 %v1351_v27, %v1349_v25 }
 0xb41   :  { %749 = vrot.lane.b32.xlu1 %v739_v28, %s1479_s1 }
 0xbb3   :  { %v750_v29 = vpop.permute.xlu1 %749 }
 0xbb4   :  { %1076 = vmatmul.mubr.msk.f32.vlgmr.msra.gmra.mrb[6].mxu0 %vm113_vm0, %v750_v29 }
 0xbb5   :  { %1109 = vmatprep.mubr.msk.f32.mxu0 %vm1488_vm1, %v1477_v0  ;;  %1242 = vmatpush3.bf16.msra.mxu0 %v1241_v22 }
 0xbb6   :  { %1243 = vmatprep.subr.bf16.mxu0 %v1487_v16 }
 0xbb9   :  { %1245 = vmatpush3.bf16.msra.mxu0 %v1244_v44 }
 0xbba   :  { %1246 = vmatprep.subr.bf16.mxu0 %v1487_v16 }
 0xbbd   :  { %1248 = vmatpush3.bf16.msra.mxu0 %v1247_v26 }
 0xbbe   :  { %1249 = vmatprep.subr.bf16.mxu0 %v1487_v16 }
 0xbc1   :  { %1251 = vmatpush3.bf16.msra.mxu0 %v1250_v17 }
 0xc87   :  { %v819_v34 = vpop.f32.mrb[6].mxu0 }
 0xc88   :  { %v820_v36 = vadd.f32 %v819_v34, %v746_v33  ;;  %v821_v37 = vpop.f32.mrb[7].mxu0 }
 0xc89   :  { %v822_v42 = vadd.f32 %v821_v37, %v747_v41 }
 0xc8a   :  { %v1077_v38 = vmul.f32 -1.442695, %v820_v36 }
 0xc8b   :  { %v1078_v49 = vmul.f32 -1.442695, %v822_v42 }
 0xc8c   :  { %1352 = vpow2.f32 %v1077_v38 }
 0xc8d   :  { %1354 = vtanh.f32 %v822_v42 }
 0xc96   :  { %v1353_v43 = vpop.eup %1352 }
 0xc97   :  { %v827_v45 = vadd.f32 1.0, %v1353_v43  ;;  %v1355_v46 = vpop.eup %1354 }
 0xc99   :  { %1356 = vrcp.f32 %v827_v45 }
 0xc9a   :  { %1358 = vpow2.f32 %v1078_v49 }
 0xca3   :  { %v1357_v47 = vpop.eup %1356 }
 0xca4   :  { %v838_v48 = vmul.f32 %v1357_v47, %v1355_v46  ;;  %v1359_v50 = vpop.eup %1358  ;;  %v837_v52 = vmul.f32 %v1357_v47, %v737_v21 }
 0xca5   :  { %v834_v51 = vadd.f32 1.0, %v1359_v50 }
 0xca6   :  { %840 = vrot.lane.b32.xlu1 %v838_v48, %s1479_s1 }
 0xca7   :  { %1360 = vrcp.f32 %v834_v51 }
 0xcb1   :  { %v1361_v56 = vpop.eup %1360 }
 0xd18   :  { %v841_v53 = vpop.permute.xlu1 %840 }
 0xd19   :  { %v843_v54 = vadd.f32 %v841_v53, %v837_v52 }
 0xd1b   :  { %1362 = vtanh.f32 %v843_v54 }
 0xd25   :  { %v1363_v57 = vpop.eup %1362 }
 0xd26   :  { %v845_v58 = vmul.f32 %v1363_v57, %v1361_v56 }
 0xd28   :  { %855 = vrot.lane.b32.xlu1 %v845_v58, %s1479_s1 }
 0xd9a   :  { %v856_v59 = vpop.permute.xlu1 %855 }
 0xd9b   :  { %1079 = vmatmul.mubr.msk.f32.vlgmr.msra.gmra.mrb[6].mxu1 %vm113_vm0, %v856_v59 }
 0xe6e   :  { %v925_v63 = vpop.f32.mrb[6].mxu1 }
 0xe6f   :  { %v926_v1 = vadd.f32 %v925_v63, %v852_v62  ;;  %v927_v2 = vpop.f32.mrb[7].mxu1 }
 0xe70   :  { %v928_v6 = vadd.f32 %v927_v2, %v853_v19 }
 0xe71   :  { %v1080_v3 = vmul.f32 -1.442695, %v926_v1 }
 0xe72   :  { %v1081_v18 = vmul.f32 -1.442695, %v928_v6 }
 0xe73   :  { %1364 = vpow2.f32 %v1080_v3 }
 0xe74   :  { %1366 = vtanh.f32 %v928_v6 }
 0xe7d   :  { %v1365_v9 = vpop.eup %1364 }
 0xe7e   :  { %v933_v7 = vadd.f32 1.0, %v1365_v9  ;;  %v1367_v8 = vpop.eup %1366 }
 0xe80   :  { %1368 = vrcp.f32 %v933_v7 }
 0xe81   :  { %1370 = vpow2.f32 %v1081_v18 }
 0xe8a   :  { %v1369_v11 = vpop.eup %1368 }
 0xe8b   :  { %v944_v10 = vmul.f32 %v1369_v11, %v1367_v8  ;;  %v1371_v5 = vpop.eup %1370  ;;  %v943_v21 = vmul.f32 %v1369_v11, %v843_v54 }
 0xe8c   :  { %v940_v20 = vadd.f32 1.0, %v1371_v5 }
 0xe8d   :  { %946 = vrot.lane.b32.xlu1 %v944_v10, %s1479_s1 }
 0xe8e   :  { %1372 = vrcp.f32 %v940_v20 }
 0xe98   :  { %v1373_v25 = vpop.eup %1372 }
 0xeff   :  { %v947_v0 = vpop.permute.xlu1 %946 }
 0xf00   :  { %v949_v24 = vadd.f32 %v947_v0, %v943_v21 }
 0xf02   :  { %1374 = vtanh.f32 %v949_v24 }
 0xf0c   :  { %v1375_v27 = vpop.eup %1374 }
 0xf0d   :  { %v951_v28 = vmul.f32 %v1375_v27, %v1373_v25 }
 0xf0f   :  { %968 = vrot.lane.b32.xlu1 %v951_v28, %s1479_s1 }
 0xf81   :  { %v969_v29 = vpop.permute.xlu1 %968 }
 0xf82   :  { %1110 = vmatmul.mubr.msk.f32.vlgmr.msra.gmra.mrb[8].mxu0 %vm113_vm0, %v969_v29 }
0x1055   :  { %v1038_v32 = vpop.f32.mrb[8].mxu0 }
0x1056   :  { %v1039_v33 = vadd.f32 %v1082_v30, %v1038_v32  ;;  %v1111_v34 = vpop.f32.mrb[9].mxu0 }
0x1058   :  { %1042 = vst [vmem:[#allocation8] sm:$0x3] %v1039_v33 }
0x1059   :  { %1453 = shalt.err (!%p1450_p0)
}
0x105a   :  { %s1454_s20 = scalar_lea.hbm %s1752_s6, 32 }
0x105b   :  { %p1455_p1 = scmp.ne.s32.totalorder %s1752_s6, %s1454_s20  ;;  %p1458_p2 = scmp.lt.u32.totalorder %s1454_s20, %s1752_s6 }
0x105d   :  { %p1460_p3 = pnand %p1458_p2, %p1455_p1 }
0x105f   :  { %1463 = shalt.err (!%p1460_p3)
}
0x1060   :  { %1052 = dma.vmem_to_hbm [thread:$0]  %s1050_s16, 32, %s1752_s6, [#allocation4]  }
0x1061   :  { %1468 = dma.done.wait [#allocation4], 32  }
0x1062   :  { %1469 = vsyncadd [#allocation4], 4294967264 }
0x1063   :  { %1056 = vsyncpa [#allocation3], 1 }
0x1064   :  { %1057 = vsyncpa [#allocation6], 1 }
0x1065   :  { %1058 = vsyncpa [#allocation4], 1 }

</bundles_post_ra>
